<compile_context>
chip_gen: v7x
topology: tpu7x:2x2x1
jax: 0.10.0
libtpu: 0.0.40
codegen_flags: <defaults>
</compile_context>

<pallas_src>
import jax
import jax.numpy as jnp
from jax.experimental import pallas as pl
from jax.experimental.pallas import tpu as pltpu

_BN_EPS = 1e-5
_MAX_LANES = 4096          # cap on folded lane length (bounds vreg/VMEM pressure)


# --------------------------- batch / lane folding --------------------------- #
def _batch_split(N, HW):
    """How many images to fold into the lane axis per grid step.

    Keeps a 2-way 'parallel' grid when the batch allows it so both v7x
    TensorCores get work (v5e/v6e have one TC and are indifferent), and caps
    the folded lane length to bound vector-register pressure."""
    g = 2 if (N >= 2 and N % 2 == 0) else 1
    imgs = N // g
    while imgs > 1 and imgs % 2 == 0 and imgs * HW > _MAX_LANES:
        imgs //= 2
        g *= 2
    return g, imgs


def _build_masks(H, W, imgs):
    """(9, imgs*H*W) f32 validity masks for the 9 conv taps.

    Lane p belongs to image p // (H*W); the masks zero taps falling outside
    their image, which also makes the in-kernel circular lane roll exact across
    folded image boundaries and across the wrap-around point."""
    HW = H * W
    L = imgs * HW
    lane = jnp.arange(L, dtype=jnp.int32)
    hh = (lane % HW) // W
    ww = lane % W
    rows = []
    for dh in (-1, 0, 1):
        for dw in (-1, 0, 1):
            rows.append((hh + dh >= 0) & (hh + dh < H) &
                        (ww + dw >= 0) & (ww + dw < W))
    return jnp.stack(rows, axis=0).astype(jnp.float32)


# ------------------------- fused per-block Pallas kernel -------------------- #
def _build_block_kernel(block_meta, W, L, in_c, out_c):
    """Kernel computing a whole DecoderBlock on one (C_max, L) slab in VMEM."""
    c_max = block_meta["c_max"]
    cells = block_meta["cells"]
    has_skip = block_meta["has_skip"]
    use_roll = (L % 128 == 0)          # lane axis vreg-aligned -> XLU vrot path

    def kernel(*refs):
        if has_skip:
            x_ref, mask_ref, vecs_ref, wconv_ref, wskip_ref, o_ref = refs
        else:
            x_ref, mask_ref, vecs_ref, wconv_ref, o_ref = refs
            wskip_ref = None

        def col(j):                                   # (c_max, 1) per-channel vec
            return vecs_ref[:, j:j + 1]

        def shift_lanes(v, delta):                    # y[:, p] = v[:, (p+delta) % L]
            if delta == 0:
                return v
            if use_roll:
                return pltpu.roll(v, shift=(-delta) % L, axis=1)   # XLU rotate
            d = delta % L                              # fallback for unaligned L
            return jnp.concatenate([v[:, d:], v[:, :d]], axis=1)

        def bn_swish(h, sj, tj):                      # f32 elementwise (v5e-safe)
            y = h * col(sj) + col(tj)
            return y * jax.nn.sigmoid(y)

        def conv3x3(h, conv_idx, bj):
            # 9 per-tap matmuls accumulated in f32: small live set, no im2col buf.
            acc = None
            t = 0
            for dh in (-1, 0, 1):
                for dw in (-1, 0, 1):
                    s = shift_lanes(h, dh * W + dw)
                    if dh != 0 or dw != 0:
                        s = s * mask_ref[t:t + 1, :]   # f32 mask mul (v5e-safe)
                    d = jnp.dot(wconv_ref[conv_idx * 9 + t, :, :],
                                s.astype(jnp.bfloat16),
                                preferred_element_type=jnp.float32)
                    acc = d if acc is None else acc + d
                    t += 1
            return acc + col(bj)

        x = x_ref[...].astype(jnp.float32)                           # (in_c, L)
        if in_c < c_max:                                             # zero-pad chans
            x = jnp.concatenate(
                [x, jnp.zeros((c_max - in_c, L), jnp.float32)], axis=0)

        for cm in cells:
            cols = cm["cols"]
            if cm["has_proj"]:              # 1x1 skip proj: bf16 MXU, f32 accum
                skip = jnp.dot(wskip_ref[cm["proj"], :, :],
                               x.astype(jnp.bfloat16),
                               preferred_element_type=jnp.float32) + col(cols["bs"])
            else:
                skip = x
            h = bn_swish(x, cols["s1"], cols["t1"])
            h = conv3x3(h, cm["conv"], cols["b1"])
            h = bn_swish(h, cols["s2"], cols["t2"])
            h = conv3x3(h, cm["conv"] + 1, cols["b2"])
            x = h + skip                                              # residual, f32

        o_ref[...] = x[:out_c, :].astype(o_ref.dtype)                 # lane-dense store

    return kernel


def _build_block_call(block_meta, packed, G, L, W, in_c, out_c, dtype):
    # TODO(synk): at much larger C / H*W, tile the lane axis (with halo handling)
    # and set pltpu.CompilerParams(vmem_limit_bytes=...) explicitly -- v7x has
    # 64 MiB physical / 32 MiB default scoped VMEM, v5e only 16 MiB scoped.
    in_specs = [
        pl.BlockSpec((None, in_c, L), lambda g: (g, 0, 0)),           # activations
        pl.BlockSpec((9, L), lambda g: (0, 0)),                       # tap masks
        pl.BlockSpec(packed["vecs"].shape, lambda g: (0, 0)),         # per-channel vecs
        pl.BlockSpec(packed["wconv"].shape, lambda g: (0, 0, 0)),     # conv weights
    ]
    if block_meta["has_skip"]:
        in_specs.append(pl.BlockSpec(packed["wskip"].shape, lambda g: (0, 0, 0)))
    return pl.pallas_call(
        _build_block_kernel(block_meta, W, L, in_c, out_c),
        out_shape=jax.ShapeDtypeStruct((G, out_c, L), dtype),
        grid=(G,),
        in_specs=in_specs,
        out_specs=pl.BlockSpec((None, out_c, L), lambda g: (g, 0, 0)),
        compiler_params=pltpu.CompilerParams(
            dimension_semantics=("parallel",)),    # batch-group axis -> 2 TCs on v7x
    )


# --------------------------- parameter construction ------------------------- #
def _init_cell_params(key, in_c, out_c, stride):
    ks = jax.random.split(key, 10)
    p = {
        "stride": stride, "in_c": in_c, "out_c": out_c,
        "g1": 1.0 + 0.05 * jax.random.normal(ks[0], (in_c,), jnp.float32),
        "beta1": 0.05 * jax.random.normal(ks[1], (in_c,), jnp.float32),
        "rm1": jnp.zeros((in_c,), jnp.float32),
        "rv1": jnp.ones((in_c,), jnp.float32),
        "w1": jax.random.normal(ks[2], (3, 3, in_c, out_c), jnp.float32)
              / jnp.sqrt(9.0 * in_c),
        "bias1": 0.01 * jax.random.normal(ks[3], (out_c,), jnp.float32),
        "g2": 1.0 + 0.05 * jax.random.normal(ks[4], (out_c,), jnp.float32),
        "beta2": 0.05 * jax.random.normal(ks[5], (out_c,), jnp.float32),
        "rm2": jnp.zeros((out_c,), jnp.float32),
        "rv2": jnp.ones((out_c,), jnp.float32),
        "w2": jax.random.normal(ks[6], (3, 3, out_c, out_c), jnp.float32)
              / jnp.sqrt(9.0 * out_c),
        "bias2": 0.01 * jax.random.normal(ks[7], (out_c,), jnp.float32),
    }
    if in_c != out_c:
        p["ws"] = jax.random.normal(ks[8], (in_c, out_c), jnp.float32) / jnp.sqrt(float(in_c))
        p["bs"] = 0.01 * jax.random.normal(ks[9], (out_c,), jnp.float32)
    return p


def _pack_block(cells):
    """Fold eval-mode BN into per-channel scale/shift, zero-pad every cell to the
    block-wide C_max (exact), and pack ALL per-channel vectors / conv taps /
    skip projections of the block into three operands total."""
    c_max = max(max(c["in_c"], c["out_c"]) for c in cells)

    def padv(v):
        return jnp.pad(v.astype(jnp.float32), (0, c_max - v.shape[0]))

    def pack_conv(w, ci, co):                  # (3,3,ci,co) -> (9, c_max, c_max) bf16
        w9 = jnp.transpose(w, (0, 1, 3, 2)).reshape(9, co, ci)
        return jnp.pad(w9, ((0, 0), (0, c_max - co), (0, c_max - ci))).astype(jnp.bfloat16)

    vec_cols, conv_ws, skip_ws, cell_metas = [], [], [], []
    for c in cells:
        in_c, out_c = c["in_c"], c["out_c"]
        s1 = c["g1"] / jnp.sqrt(c["rv1"] + _BN_EPS)
        t1 = c["beta1"] - c["rm1"] * s1
        s2 = c["g2"] / jnp.sqrt(c["rv2"] + _BN_EPS)
        t2 = c["beta2"] - c["rm2"] * s2
        base = len(vec_cols)
        vec_cols += [padv(s1), padv(t1), padv(c["bias1"]),
                     padv(s2), padv(t2), padv(c["bias2"])]
        conv_base = len(conv_ws)
        conv_ws += [pack_conv(c["w1"], in_c, out_c), pack_conv(c["w2"], out_c, out_c)]
        has_proj = in_c != out_c
        proj_idx, bs_col = -1, -1
        if has_proj:
            proj_idx = len(skip_ws)
            ws = jnp.transpose(c["ws"])        # (out_c, in_c)
            skip_ws.append(jnp.pad(ws, ((0, c_max - out_c), (0, c_max - in_c)))
                           .astype(jnp.bfloat16))
            bs_col = len(vec_cols)
            vec_cols.append(padv(c["bs"]))
        cell_metas.append({
            "cols": {"s1": base, "t1": base + 1, "b1": base + 2,
                     "s2": base + 3, "t2": base + 4, "b2": base + 5, "bs": bs_col},
            "conv": conv_base, "proj": proj_idx, "has_proj": has_proj,
        })

    packed = {
        "vecs": jnp.stack(vec_cols, axis=1),                    # (c_max, n_vec) f32
        "wconv": jnp.concatenate(conv_ws, axis=0),              # (9*n_convs, c_max, c_max) bf16
        "wskip": jnp.stack(skip_ws, axis=0) if skip_ws else None,
    }
    meta = {
        "cells": cell_metas, "c_max": c_max,
        "in_c": cells[0]["in_c"], "out_c": cells[-1]["out_c"],
        "upscale": cells[0]["stride"] == -1,
        "has_skip": bool(skip_ws),
    }
    return meta, packed


class DecoderTowerPallas:
    """Mirrors DecoderTower.__init__ block building; forward = blocks[level](x).
    Every non-identity DecoderBlock executes as ONE fused Pallas kernel."""

    def __init__(self, key, out_channels, number_of_scales, final_inputs_per_scale,
                 cells_per_input=1, channel_divider=2, exponential_growth_inputs=1,
                 min_splits=1):
        blocks = []
        inputs = final_inputs_per_scale
        i_channels = out_channels
        o_channels = out_channels
        self.n_inputs = 0
        for i in range(number_of_scales):
            for inputs_in_scale in range(inputs):
                upscale = inputs_in_scale == 0 and i != 0
                self.n_inputs += 1
                if not (i == 0 and inputs_in_scale == 0):
                    key, sub = jax.random.split(key)
                    cells = self._make_block(
                        sub, i_channels,
                        i_channels if not upscale else o_channels,
                        cells_per_input, upscale)
                    blocks.append(_pack_block(cells))
                else:
                    blocks.append(None)                  # nn.Identity
            o_channels = i_channels
            i_channels = o_channels * channel_divider
            inputs = max(min_splits, inputs // exponential_growth_inputs)
        blocks.reverse()
        self.blocks = blocks
        self._fwd_cache = {}

    @staticmethod
    def _make_block(key, in_channels, out_channels, number_of_cells, upscale):
        cells = []
        if upscale:
            key, sub = jax.random.split(key)
            cells.append(_init_cell_params(sub, in_channels, out_channels, stride=-1))
        for i in range(number_of_cells):
            i_ch = out_channels if upscale else in_channels
            o_ch = out_channels if (not upscale and i == number_of_cells - 1) else i_ch
            key, sub = jax.random.split(key)
            cells.append(_init_cell_params(sub, i_ch, o_ch, stride=1))
        return cells

    def _make_forward(self, level, shape, dtype):
        meta, packed = self.blocks[level]
        N, C, H, W = shape
        upscale = meta["upscale"]
        Hc, Wc = (2 * H, 2 * W) if upscale else (H, W)
        HW = Hc * Wc
        G, imgs = _batch_split(N, HW)
        L = imgs * HW
        masks = _build_masks(Hc, Wc, imgs)            # (9, L) f32, built once
        out_c = meta["out_c"]
        call = _build_block_call(meta, packed, G, L, Wc, C, out_c, dtype)

        def forward(x, masks, vecs, wconv, *maybe_wskip):
            if upscale:
                # TODO(synk): nearest 2x upsample is one small fused XLA op in the
                # wrapper; fusing it into the kernel (lane gather / selection matmul)
                # would remove this HBM round trip at larger resolutions.
                x = jnp.repeat(jnp.repeat(x, 2, axis=2), 2, axis=3)
            # Layout plumbing only: fold `imgs` images into the lane axis
            # (degenerates to a free reshape when imgs == 1).
            xg = (x.reshape(G, imgs, C, HW).transpose(0, 2, 1, 3)
                    .reshape(G, C, L))
            y = call(xg, masks, vecs, wconv, *maybe_wskip)
            return (y.reshape(G, out_c, imgs, HW).transpose(0, 2, 1, 3)
                      .reshape(N, out_c, Hc, Wc))

        return jax.jit(forward), masks

    def __call__(self, x_nchw, level):
        # TODO(synk): use_tensor_checkpoints (torch.utils.checkpoint) is a
        # training-time memory optimization with identical forward semantics.
        block = self.blocks[level]
        if block is None:                          # nn.Identity
            return x_nchw
        key = (level, tuple(x_nchw.shape), jnp.dtype(x_nchw.dtype).name)
        entry = self._fwd_cache.get(key)
        if entry is None:
            entry = self._make_forward(level, x_nchw.shape, x_nchw.dtype)
            self._fwd_cache[key] = entry
        fwd, masks = entry
        meta, packed = block
        extra = (packed["wskip"],) if meta["has_skip"] else ()
        return fwd(x_nchw, masks, packed["vecs"], packed["wconv"], *extra)


if __name__ == "__main__":
    key = jax.random.PRNGKey(0)
    kp, kx8, kx4 = jax.random.split(key, 3)

    # out_channels=4, scales=2, inputs/scale=2 ->
    # blocks (after reverse): [Block(8->8), Block(8->4, upscale x2), Block(4->4), Identity]
    tower = DecoderTowerPallas(kp, out_channels=4, number_of_scales=2,
                               final_inputs_per_scale=2)

    x8 = jax.random.normal(kx8, (2, 8, 16, 16), jnp.float32)  # NCHW, levels 0/1
    x4 = jax.random.normal(kx4, (2, 4, 16, 16), jnp.float32)  # NCHW, levels 2/3

    y0 = jax.block_until_ready(tower(x8, level=0))
    assert y0.shape == (2, 8, 16, 16), y0.shape
    y1 = jax.block_until_ready(tower(x8, level=1))   # upscale block -> 2x spatial
    assert y1.shape == (2, 4, 32, 32), y1.shape
    y2 = jax.block_until_ready(tower(x4, level=2))
    assert y2.shape == (2, 4, 16, 16), y2.shape
    y3 = jax.block_until_ready(tower(x4, level=3))   # Identity block
    assert y3.shape == (2, 4, 16, 16), y3.shape

    assert all(bool(jnp.all(jnp.isfinite(y))) for y in (y0, y1, y2, y3))
    print("KERNEL_OK")
</pallas_src>

<mosaic_0001>
module attributes {stable_mosaic.version = 11 : i64} {
  func.func @kernel(%arg0: i32, %arg1: memref<1x8x256xf32, #tpu.memory_space<vmem>>, %arg2: memref<9x256xf32, #tpu.memory_space<vmem>>, %arg3: memref<8x6xf32, #tpu.memory_space<vmem>>, %arg4: memref<18x8x8xbf16, #tpu.memory_space<vmem>>, %arg5: memref<1x8x256xf32, #tpu.memory_space<vmem>>) attributes {dimension_semantics = [#tpu.dimension_semantics<parallel>], iteration_bounds = array<i64: 2>, scalar_prefetch = 0 : i64, scratch_operands = 0 : i64, tpu.core_type = #tpu.core_type<tc>, window_params = [{transform_indices = @transform_0, window_bounds = array<i64: 1, 8, 256>}, {pipeline_mode = #tpu.pipeline_mode<synchronous>, transform_indices = @transform_1, window_bounds = array<i64: 9, 256>}, {pipeline_mode = #tpu.pipeline_mode<synchronous>, transform_indices = @transform_2, window_bounds = array<i64: 8, 6>}, {pipeline_mode = #tpu.pipeline_mode<synchronous>, transform_indices = @transform_3, window_bounds = array<i64: 18, 8, 8>}, {transform_indices = @transform_4, window_bounds = array<i64: 1, 8, 256>}]} {
    %c0 = arith.constant 0 : index
    %c0_0 = arith.constant 0 : index
    %c0_1 = arith.constant 0 : index
    %0 = vector.load %arg1[%c0, %c0_0, %c0_1] : memref<1x8x256xf32, #tpu.memory_space<vmem>>, vector<1x8x256xf32>
    %1 = vector.shape_cast %0 : vector<1x8x256xf32> to vector<8x256xf32>
    %c0_2 = arith.constant 0 : index
    %c0_3 = arith.constant 0 : index
    %2 = vector.load %arg3[%c0_2, %c0_3] : memref<8x6xf32, #tpu.memory_space<vmem>>, vector<8x1xf32>
    %3 = vector.broadcast %2 : vector<8x1xf32> to vector<8x256xf32>
    %4 = arith.mulf %1, %3 : vector<8x256xf32>
    %c0_4 = arith.constant 0 : index
    %c1 = arith.constant 1 : index
    %5 = vector.load %arg3[%c0_4, %c1] : memref<8x6xf32, #tpu.memory_space<vmem>>, vector<8x1xf32>
    %6 = vector.broadcast %5 : vector<8x1xf32> to vector<8x256xf32>
    %7 = arith.addf %4, %6 : vector<8x256xf32>
    %8 = arith.negf %7 : vector<8x256xf32>
    %9 = math.exp %8 : vector<8x256xf32>
    %cst = arith.constant 1.000000e+00 : f32
    %10 = vector.broadcast %cst : f32 to vector<8x256xf32>
    %11 = arith.addf %10, %9 : vector<8x256xf32>
    %12 = arith.divf %10, %11 : vector<8x256xf32>
    %13 = arith.mulf %7, %12 : vector<8x256xf32>
    %c17_i32 = arith.constant 17 : i32
    %14 = tpu.dynamic_rotate %13 by %c17_i32 dim 1 : vector<8x256xf32>, i32 -> vector<8x256xf32>
    %c0_5 = arith.constant 0 : index
    %c0_6 = arith.constant 0 : index
    %15 = vector.load %arg2[%c0_5, %c0_6] : memref<9x256xf32, #tpu.memory_space<vmem>>, vector<1x256xf32>
    %16 = vector.broadcast %15 : vector<1x256xf32> to vector<8x256xf32>
    %17 = arith.mulf %14, %16 : vector<8x256xf32>
    %c0_7 = arith.constant 0 : index
    %c0_8 = arith.constant 0 : index
    %c0_9 = arith.constant 0 : index
    %18 = vector.load %arg4[%c0_7, %c0_8, %c0_9] : memref<18x8x8xbf16, #tpu.memory_space<vmem>>, vector<1x8x8xbf16>
    %19 = vector.shape_cast %18 : vector<1x8x8xbf16> to vector<8x8xbf16>
    %20 = arith.truncf %17 : vector<8x256xf32> to vector<8x256xbf16>
    %cst_10 = arith.constant dense<0.000000e+00> : vector<8x256xf32>
    %21 = tpu.matmul %19, %20, %cst_10 {dimension_numbers = #tpu.dot_dimension_numbers<[1], [0], [0], [1], [0, 0, 1, 1], [], []>} : vector<8x8xbf16>, vector<8x256xbf16>, vector<8x256xf32> -> vector<8x256xf32>
    %c16_i32 = arith.constant 16 : i32
    %22 = tpu.dynamic_rotate %13 by %c16_i32 dim 1 : vector<8x256xf32>, i32 -> vector<8x256xf32>
    %c1_11 = arith.constant 1 : index
    %c0_12 = arith.constant 0 : index
    %23 = vector.load %arg2[%c1_11, %c0_12] : memref<9x256xf32, #tpu.memory_space<vmem>>, vector<1x256xf32>
    %24 = vector.broadcast %23 : vector<1x256xf32> to vector<8x256xf32>
    %25 = arith.mulf %22, %24 : vector<8x256xf32>
    %c1_13 = arith.constant 1 : index
    %c0_14 = arith.constant 0 : index
    %c0_15 = arith.constant 0 : index
    %26 = vector.load %arg4[%c1_13, %c0_14, %c0_15] : memref<18x8x8xbf16, #tpu.memory_space<vmem>>, vector<1x8x8xbf16>
    %27 = vector.shape_cast %26 : vector<1x8x8xbf16> to vector<8x8xbf16>
    %28 = arith.truncf %25 : vector<8x256xf32> to vector<8x256xbf16>
    %cst_16 = arith.constant dense<0.000000e+00> : vector<8x256xf32>
    %29 = tpu.matmul %27, %28, %cst_16 {dimension_numbers = #tpu.dot_dimension_numbers<[1], [0], [0], [1], [0, 0, 1, 1], [], []>} : vector<8x8xbf16>, vector<8x256xbf16>, vector<8x256xf32> -> vector<8x256xf32>
    %30 = arith.addf %21, %29 : vector<8x256xf32>
    %c15_i32 = arith.constant 15 : i32
    %31 = tpu.dynamic_rotate %13 by %c15_i32 dim 1 : vector<8x256xf32>, i32 -> vector<8x256xf32>
    %c2 = arith.constant 2 : index
    %c0_17 = arith.constant 0 : index
    %32 = vector.load %arg2[%c2, %c0_17] : memref<9x256xf32, #tpu.memory_space<vmem>>, vector<1x256xf32>
    %33 = vector.broadcast %32 : vector<1x256xf32> to vector<8x256xf32>
    %34 = arith.mulf %31, %33 : vector<8x256xf32>
    %c2_18 = arith.constant 2 : index
    %c0_19 = arith.constant 0 : index
    %c0_20 = arith.constant 0 : index
    %35 = vector.load %arg4[%c2_18, %c0_19, %c0_20] : memref<18x8x8xbf16, #tpu.memory_space<vmem>>, vector<1x8x8xbf16>
    %36 = vector.shape_cast %35 : vector<1x8x8xbf16> to vector<8x8xbf16>
    %37 = arith.truncf %34 : vector<8x256xf32> to vector<8x256xbf16>
    %cst_21 = arith.constant dense<0.000000e+00> : vector<8x256xf32>
    %38 = tpu.matmul %36, %37, %cst_21 {dimension_numbers = #tpu.dot_dimension_numbers<[1], [0], [0], [1], [0, 0, 1, 1], [], []>} : vector<8x8xbf16>, vector<8x256xbf16>, vector<8x256xf32> -> vector<8x256xf32>
    %39 = arith.addf %30, %38 : vector<8x256xf32>
    %c1_i32 = arith.constant 1 : i32
    %40 = tpu.dynamic_rotate %13 by %c1_i32 dim 1 : vector<8x256xf32>, i32 -> vector<8x256xf32>
    %c3 = arith.constant 3 : index
    %c0_22 = arith.constant 0 : index
    %41 = vector.load %arg2[%c3, %c0_22] : memref<9x256xf32, #tpu.memory_space<vmem>>, vector<1x256xf32>
    %42 = vector.broadcast %41 : vector<1x256xf32> to vector<8x256xf32>
    %43 = arith.mulf %40, %42 : vector<8x256xf32>
    %c3_23 = arith.constant 3 : index
    %c0_24 = arith.constant 0 : index
    %c0_25 = arith.constant 0 : index
    %44 = vector.load %arg4[%c3_23, %c0_24, %c0_25] : memref<18x8x8xbf16, #tpu.memory_space<vmem>>, vector<1x8x8xbf16>
    %45 = vector.shape_cast %44 : vector<1x8x8xbf16> to vector<8x8xbf16>
    %46 = arith.truncf %43 : vector<8x256xf32> to vector<8x256xbf16>
    %cst_26 = arith.constant dense<0.000000e+00> : vector<8x256xf32>
    %47 = tpu.matmul %45, %46, %cst_26 {dimension_numbers = #tpu.dot_dimension_numbers<[1], [0], [0], [1], [0, 0, 1, 1], [], []>} : vector<8x8xbf16>, vector<8x256xbf16>, vector<8x256xf32> -> vector<8x256xf32>
    %48 = arith.addf %39, %47 : vector<8x256xf32>
    %c4 = arith.constant 4 : index
    %c0_27 = arith.constant 0 : index
    %c0_28 = arith.constant 0 : index
    %49 = vector.load %arg4[%c4, %c0_27, %c0_28] : memref<18x8x8xbf16, #tpu.memory_space<vmem>>, vector<1x8x8xbf16>
    %50 = vector.shape_cast %49 : vector<1x8x8xbf16> to vector<8x8xbf16>
    %51 = arith.truncf %13 : vector<8x256xf32> to vector<8x256xbf16>
    %cst_29 = arith.constant dense<0.000000e+00> : vector<8x256xf32>
    %52 = tpu.matmul %50, %51, %cst_29 {dimension_numbers = #tpu.dot_dimension_numbers<[1], [0], [0], [1], [0, 0, 1, 1], [], []>} : vector<8x8xbf16>, vector<8x256xbf16>, vector<8x256xf32> -> vector<8x256xf32>
    %53 = arith.addf %48, %52 : vector<8x256xf32>
    %c255_i32 = arith.constant 255 : i32
    %54 = tpu.dynamic_rotate %13 by %c255_i32 dim 1 : vector<8x256xf32>, i32 -> vector<8x256xf32>
    %c5 = arith.constant 5 : index
    %c0_30 = arith.constant 0 : index
    %55 = vector.load %arg2[%c5, %c0_30] : memref<9x256xf32, #tpu.memory_space<vmem>>, vector<1x256xf32>
    %56 = vector.broadcast %55 : vector<1x256xf32> to vector<8x256xf32>
    %57 = arith.mulf %54, %56 : vector<8x256xf32>
    %c5_31 = arith.constant 5 : index
    %c0_32 = arith.constant 0 : index
    %c0_33 = arith.constant 0 : index
    %58 = vector.load %arg4[%c5_31, %c0_32, %c0_33] : memref<18x8x8xbf16, #tpu.memory_space<vmem>>, vector<1x8x8xbf16>
    %59 = vector.shape_cast %58 : vector<1x8x8xbf16> to vector<8x8xbf16>
    %60 = arith.truncf %57 : vector<8x256xf32> to vector<8x256xbf16>
    %cst_34 = arith.constant dense<0.000000e+00> : vector<8x256xf32>
    %61 = tpu.matmul %59, %60, %cst_34 {dimension_numbers = #tpu.dot_dimension_numbers<[1], [0], [0], [1], [0, 0, 1, 1], [], []>} : vector<8x8xbf16>, vector<8x256xbf16>, vector<8x256xf32> -> vector<8x256xf32>
    %62 = arith.addf %53, %61 : vector<8x256xf32>
    %c241_i32 = arith.constant 241 : i32
    %63 = tpu.dynamic_rotate %13 by %c241_i32 dim 1 : vector<8x256xf32>, i32 -> vector<8x256xf32>
    %c6 = arith.constant 6 : index
    %c0_35 = arith.constant 0 : index
    %64 = vector.load %arg2[%c6, %c0_35] : memref<9x256xf32, #tpu.memory_space<vmem>>, vector<1x256xf32>
    %65 = vector.broadcast %64 : vector<1x256xf32> to vector<8x256xf32>
    %66 = arith.mulf %63, %65 : vector<8x256xf32>
    %c6_36 = arith.constant 6 : index
    %c0_37 = arith.constant 0 : index
    %c0_38 = arith.constant 0 : index
    %67 = vector.load %arg4[%c6_36, %c0_37, %c0_38] : memref<18x8x8xbf16, #tpu.memory_space<vmem>>, vector<1x8x8xbf16>
    %68 = vector.shape_cast %67 : vector<1x8x8xbf16> to vector<8x8xbf16>
    %69 = arith.truncf %66 : vector<8x256xf32> to vector<8x256xbf16>
    %cst_39 = arith.constant dense<0.000000e+00> : vector<8x256xf32>
    %70 = tpu.matmul %68, %69, %cst_39 {dimension_numbers = #tpu.dot_dimension_numbers<[1], [0], [0], [1], [0, 0, 1, 1], [], []>} : vector<8x8xbf16>, vector<8x256xbf16>, vector<8x256xf32> -> vector<8x256xf32>
    %71 = arith.addf %62, %70 : vector<8x256xf32>
    %c240_i32 = arith.constant 240 : i32
    %72 = tpu.dynamic_rotate %13 by %c240_i32 dim 1 : vector<8x256xf32>, i32 -> vector<8x256xf32>
    %c7 = arith.constant 7 : index
    %c0_40 = arith.constant 0 : index
    %73 = vector.load %arg2[%c7, %c0_40] : memref<9x256xf32, #tpu.memory_space<vmem>>, vector<1x256xf32>
    %74 = vector.broadcast %73 : vector<1x256xf32> to vector<8x256xf32>
    %75 = arith.mulf %72, %74 : vector<8x256xf32>
    %c7_41 = arith.constant 7 : index
    %c0_42 = arith.constant 0 : index
    %c0_43 = arith.constant 0 : index
    %76 = vector.load %arg4[%c7_41, %c0_42, %c0_43] : memref<18x8x8xbf16, #tpu.memory_space<vmem>>, vector<1x8x8xbf16>
    %77 = vector.shape_cast %76 : vector<1x8x8xbf16> to vector<8x8xbf16>
    %78 = arith.truncf %75 : vector<8x256xf32> to vector<8x256xbf16>
    %cst_44 = arith.constant dense<0.000000e+00> : vector<8x256xf32>
    %79 = tpu.matmul %77, %78, %cst_44 {dimension_numbers = #tpu.dot_dimension_numbers<[1], [0], [0], [1], [0, 0, 1, 1], [], []>} : vector<8x8xbf16>, vector<8x256xbf16>, vector<8x256xf32> -> vector<8x256xf32>
    %80 = arith.addf %71, %79 : vector<8x256xf32>
    %c239_i32 = arith.constant 239 : i32
    %81 = tpu.dynamic_rotate %13 by %c239_i32 dim 1 : vector<8x256xf32>, i32 -> vector<8x256xf32>
    %c8 = arith.constant 8 : index
    %c0_45 = arith.constant 0 : index
    %82 = vector.load %arg2[%c8, %c0_45] : memref<9x256xf32, #tpu.memory_space<vmem>>, vector<1x256xf32>
    %83 = vector.broadcast %82 : vector<1x256xf32> to vector<8x256xf32>
    %84 = arith.mulf %81, %83 : vector<8x256xf32>
    %c8_46 = arith.constant 8 : index
    %c0_47 = arith.constant 0 : index
    %c0_48 = arith.constant 0 : index
    %85 = vector.load %arg4[%c8_46, %c0_47, %c0_48] : memref<18x8x8xbf16, #tpu.memory_space<vmem>>, vector<1x8x8xbf16>
    %86 = vector.shape_cast %85 : vector<1x8x8xbf16> to vector<8x8xbf16>
    %87 = arith.truncf %84 : vector<8x256xf32> to vector<8x256xbf16>
    %cst_49 = arith.constant dense<0.000000e+00> : vector<8x256xf32>
    %88 = tpu.matmul %86, %87, %cst_49 {dimension_numbers = #tpu.dot_dimension_numbers<[1], [0], [0], [1], [0, 0, 1, 1], [], []>} : vector<8x8xbf16>, vector<8x256xbf16>, vector<8x256xf32> -> vector<8x256xf32>
    %89 = arith.addf %80, %88 : vector<8x256xf32>
    %c0_50 = arith.constant 0 : index
    %c2_51 = arith.constant 2 : index
    %90 = vector.load %arg3[%c0_50, %c2_51] : memref<8x6xf32, #tpu.memory_space<vmem>>, vector<8x1xf32>
    %91 = vector.broadcast %90 : vector<8x1xf32> to vector<8x256xf32>
    %92 = arith.addf %89, %91 : vector<8x256xf32>
    %c0_52 = arith.constant 0 : index
    %c3_53 = arith.constant 3 : index
    %93 = vector.load %arg3[%c0_52, %c3_53] : memref<8x6xf32, #tpu.memory_space<vmem>>, vector<8x1xf32>
    %94 = vector.broadcast %93 : vector<8x1xf32> to vector<8x256xf32>
    %95 = arith.mulf %92, %94 : vector<8x256xf32>
    %c0_54 = arith.constant 0 : index
    %c4_55 = arith.constant 4 : index
    %96 = vector.load %arg3[%c0_54, %c4_55] : memref<8x6xf32, #tpu.memory_space<vmem>>, vector<8x1xf32>
    %97 = vector.broadcast %96 : vector<8x1xf32> to vector<8x256xf32>
    %98 = arith.addf %95, %97 : vector<8x256xf32>
    %99 = arith.negf %98 : vector<8x256xf32>
    %100 = math.exp %99 : vector<8x256xf32>
    %cst_56 = arith.constant 1.000000e+00 : f32
    %101 = vector.broadcast %cst_56 : f32 to vector<8x256xf32>
    %102 = arith.addf %101, %100 : vector<8x256xf32>
    %103 = arith.divf %101, %102 : vector<8x256xf32>
    %104 = arith.mulf %98, %103 : vector<8x256xf32>
    %c17_i32_57 = arith.constant 17 : i32
    %105 = tpu.dynamic_rotate %104 by %c17_i32_57 dim 1 : vector<8x256xf32>, i32 -> vector<8x256xf32>
    %c0_58 = arith.constant 0 : index
    %c0_59 = arith.constant 0 : index
    %106 = vector.load %arg2[%c0_58, %c0_59] : memref<9x256xf32, #tpu.memory_space<vmem>>, vector<1x256xf32>
    %107 = vector.broadcast %106 : vector<1x256xf32> to vector<8x256xf32>
    %108 = arith.mulf %105, %107 : vector<8x256xf32>
    %c9 = arith.constant 9 : index
    %c0_60 = arith.constant 0 : index
    %c0_61 = arith.constant 0 : index
    %109 = vector.load %arg4[%c9, %c0_60, %c0_61] : memref<18x8x8xbf16, #tpu.memory_space<vmem>>, vector<1x8x8xbf16>
    %110 = vector.shape_cast %109 : vector<1x8x8xbf16> to vector<8x8xbf16>
    %111 = arith.truncf %108 : vector<8x256xf32> to vector<8x256xbf16>
    %cst_62 = arith.constant dense<0.000000e+00> : vector<8x256xf32>
    %112 = tpu.matmul %110, %111, %cst_62 {dimension_numbers = #tpu.dot_dimension_numbers<[1], [0], [0], [1], [0, 0, 1, 1], [], []>} : vector<8x8xbf16>, vector<8x256xbf16>, vector<8x256xf32> -> vector<8x256xf32>
    %c16_i32_63 = arith.constant 16 : i32
    %113 = tpu.dynamic_rotate %104 by %c16_i32_63 dim 1 : vector<8x256xf32>, i32 -> vector<8x256xf32>
    %c1_64 = arith.constant 1 : index
    %c0_65 = arith.constant 0 : index
    %114 = vector.load %arg2[%c1_64, %c0_65] : memref<9x256xf32, #tpu.memory_space<vmem>>, vector<1x256xf32>
    %115 = vector.broadcast %114 : vector<1x256xf32> to vector<8x256xf32>
    %116 = arith.mulf %113, %115 : vector<8x256xf32>
    %c10 = arith.constant 10 : index
    %c0_66 = arith.constant 0 : index
    %c0_67 = arith.constant 0 : index
    %117 = vector.load %arg4[%c10, %c0_66, %c0_67] : memref<18x8x8xbf16, #tpu.memory_space<vmem>>, vector<1x8x8xbf16>
    %118 = vector.shape_cast %117 : vector<1x8x8xbf16> to vector<8x8xbf16>
    %119 = arith.truncf %116 : vector<8x256xf32> to vector<8x256xbf16>
    %cst_68 = arith.constant dense<0.000000e+00> : vector<8x256xf32>
    %120 = tpu.matmul %118, %119, %cst_68 {dimension_numbers = #tpu.dot_dimension_numbers<[1], [0], [0], [1], [0, 0, 1, 1], [], []>} : vector<8x8xbf16>, vector<8x256xbf16>, vector<8x256xf32> -> vector<8x256xf32>
    %121 = arith.addf %112, %120 : vector<8x256xf32>
    %c15_i32_69 = arith.constant 15 : i32
    %122 = tpu.dynamic_rotate %104 by %c15_i32_69 dim 1 : vector<8x256xf32>, i32 -> vector<8x256xf32>
    %c2_70 = arith.constant 2 : index
    %c0_71 = arith.constant 0 : index
    %123 = vector.load %arg2[%c2_70, %c0_71] : memref<9x256xf32, #tpu.memory_space<vmem>>, vector<1x256xf32>
    %124 = vector.broadcast %123 : vector<1x256xf32> to vector<8x256xf32>
    %125 = arith.mulf %122, %124 : vector<8x256xf32>
    %c11 = arith.constant 11 : index
    %c0_72 = arith.constant 0 : index
    %c0_73 = arith.constant 0 : index
    %126 = vector.load %arg4[%c11, %c0_72, %c0_73] : memref<18x8x8xbf16, #tpu.memory_space<vmem>>, vector<1x8x8xbf16>
    %127 = vector.shape_cast %126 : vector<1x8x8xbf16> to vector<8x8xbf16>
    %128 = arith.truncf %125 : vector<8x256xf32> to vector<8x256xbf16>
    %cst_74 = arith.constant dense<0.000000e+00> : vector<8x256xf32>
    %129 = tpu.matmul %127, %128, %cst_74 {dimension_numbers = #tpu.dot_dimension_numbers<[1], [0], [0], [1], [0, 0, 1, 1], [], []>} : vector<8x8xbf16>, vector<8x256xbf16>, vector<8x256xf32> -> vector<8x256xf32>
    %130 = arith.addf %121, %129 : vector<8x256xf32>
    %c1_i32_75 = arith.constant 1 : i32
    %131 = tpu.dynamic_rotate %104 by %c1_i32_75 dim 1 : vector<8x256xf32>, i32 -> vector<8x256xf32>
    %c3_76 = arith.constant 3 : index
    %c0_77 = arith.constant 0 : index
    %132 = vector.load %arg2[%c3_76, %c0_77] : memref<9x256xf32, #tpu.memory_space<vmem>>, vector<1x256xf32>
    %133 = vector.broadcast %132 : vector<1x256xf32> to vector<8x256xf32>
    %134 = arith.mulf %131, %133 : vector<8x256xf32>
    %c12 = arith.constant 12 : index
    %c0_78 = arith.constant 0 : index
    %c0_79 = arith.constant 0 : index
    %135 = vector.load %arg4[%c12, %c0_78, %c0_79] : memref<18x8x8xbf16, #tpu.memory_space<vmem>>, vector<1x8x8xbf16>
    %136 = vector.shape_cast %135 : vector<1x8x8xbf16> to vector<8x8xbf16>
    %137 = arith.truncf %134 : vector<8x256xf32> to vector<8x256xbf16>
    %cst_80 = arith.constant dense<0.000000e+00> : vector<8x256xf32>
    %138 = tpu.matmul %136, %137, %cst_80 {dimension_numbers = #tpu.dot_dimension_numbers<[1], [0], [0], [1], [0, 0, 1, 1], [], []>} : vector<8x8xbf16>, vector<8x256xbf16>, vector<8x256xf32> -> vector<8x256xf32>
    %139 = arith.addf %130, %138 : vector<8x256xf32>
    %c13 = arith.constant 13 : index
    %c0_81 = arith.constant 0 : index
    %c0_82 = arith.constant 0 : index
    %140 = vector.load %arg4[%c13, %c0_81, %c0_82] : memref<18x8x8xbf16, #tpu.memory_space<vmem>>, vector<1x8x8xbf16>
    %141 = vector.shape_cast %140 : vector<1x8x8xbf16> to vector<8x8xbf16>
    %142 = arith.truncf %104 : vector<8x256xf32> to vector<8x256xbf16>
    %cst_83 = arith.constant dense<0.000000e+00> : vector<8x256xf32>
    %143 = tpu.matmul %141, %142, %cst_83 {dimension_numbers = #tpu.dot_dimension_numbers<[1], [0], [0], [1], [0, 0, 1, 1], [], []>} : vector<8x8xbf16>, vector<8x256xbf16>, vector<8x256xf32> -> vector<8x256xf32>
    %144 = arith.addf %139, %143 : vector<8x256xf32>
    %c255_i32_84 = arith.constant 255 : i32
    %145 = tpu.dynamic_rotate %104 by %c255_i32_84 dim 1 : vector<8x256xf32>, i32 -> vector<8x256xf32>
    %c5_85 = arith.constant 5 : index
    %c0_86 = arith.constant 0 : index
    %146 = vector.load %arg2[%c5_85, %c0_86] : memref<9x256xf32, #tpu.memory_space<vmem>>, vector<1x256xf32>
    %147 = vector.broadcast %146 : vector<1x256xf32> to vector<8x256xf32>
    %148 = arith.mulf %145, %147 : vector<8x256xf32>
    %c14 = arith.constant 14 : index
    %c0_87 = arith.constant 0 : index
    %c0_88 = arith.constant 0 : index
    %149 = vector.load %arg4[%c14, %c0_87, %c0_88] : memref<18x8x8xbf16, #tpu.memory_space<vmem>>, vector<1x8x8xbf16>
    %150 = vector.shape_cast %149 : vector<1x8x8xbf16> to vector<8x8xbf16>
    %151 = arith.truncf %148 : vector<8x256xf32> to vector<8x256xbf16>
    %cst_89 = arith.constant dense<0.000000e+00> : vector<8x256xf32>
    %152 = tpu.matmul %150, %151, %cst_89 {dimension_numbers = #tpu.dot_dimension_numbers<[1], [0], [0], [1], [0, 0, 1, 1], [], []>} : vector<8x8xbf16>, vector<8x256xbf16>, vector<8x256xf32> -> vector<8x256xf32>
    %153 = arith.addf %144, %152 : vector<8x256xf32>
    %c241_i32_90 = arith.constant 241 : i32
    %154 = tpu.dynamic_rotate %104 by %c241_i32_90 dim 1 : vector<8x256xf32>, i32 -> vector<8x256xf32>
    %c6_91 = arith.constant 6 : index
    %c0_92 = arith.constant 0 : index
    %155 = vector.load %arg2[%c6_91, %c0_92] : memref<9x256xf32, #tpu.memory_space<vmem>>, vector<1x256xf32>
    %156 = vector.broadcast %155 : vector<1x256xf32> to vector<8x256xf32>
    %157 = arith.mulf %154, %156 : vector<8x256xf32>
    %c15 = arith.constant 15 : index
    %c0_93 = arith.constant 0 : index
    %c0_94 = arith.constant 0 : index
    %158 = vector.load %arg4[%c15, %c0_93, %c0_94] : memref<18x8x8xbf16, #tpu.memory_space<vmem>>, vector<1x8x8xbf16>
    %159 = vector.shape_cast %158 : vector<1x8x8xbf16> to vector<8x8xbf16>
    %160 = arith.truncf %157 : vector<8x256xf32> to vector<8x256xbf16>
    %cst_95 = arith.constant dense<0.000000e+00> : vector<8x256xf32>
    %161 = tpu.matmul %159, %160, %cst_95 {dimension_numbers = #tpu.dot_dimension_numbers<[1], [0], [0], [1], [0, 0, 1, 1], [], []>} : vector<8x8xbf16>, vector<8x256xbf16>, vector<8x256xf32> -> vector<8x256xf32>
    %162 = arith.addf %153, %161 : vector<8x256xf32>
    %c240_i32_96 = arith.constant 240 : i32
    %163 = tpu.dynamic_rotate %104 by %c240_i32_96 dim 1 : vector<8x256xf32>, i32 -> vector<8x256xf32>
    %c7_97 = arith.constant 7 : index
    %c0_98 = arith.constant 0 : index
    %164 = vector.load %arg2[%c7_97, %c0_98] : memref<9x256xf32, #tpu.memory_space<vmem>>, vector<1x256xf32>
    %165 = vector.broadcast %164 : vector<1x256xf32> to vector<8x256xf32>
    %166 = arith.mulf %163, %165 : vector<8x256xf32>
    %c16 = arith.constant 16 : index
    %c0_99 = arith.constant 0 : index
    %c0_100 = arith.constant 0 : index
    %167 = vector.load %arg4[%c16, %c0_99, %c0_100] : memref<18x8x8xbf16, #tpu.memory_space<vmem>>, vector<1x8x8xbf16>
    %168 = vector.shape_cast %167 : vector<1x8x8xbf16> to vector<8x8xbf16>
    %169 = arith.truncf %166 : vector<8x256xf32> to vector<8x256xbf16>
    %cst_101 = arith.constant dense<0.000000e+00> : vector<8x256xf32>
    %170 = tpu.matmul %168, %169, %cst_101 {dimension_numbers = #tpu.dot_dimension_numbers<[1], [0], [0], [1], [0, 0, 1, 1], [], []>} : vector<8x8xbf16>, vector<8x256xbf16>, vector<8x256xf32> -> vector<8x256xf32>
    %171 = arith.addf %162, %170 : vector<8x256xf32>
    %c239_i32_102 = arith.constant 239 : i32
    %172 = tpu.dynamic_rotate %104 by %c239_i32_102 dim 1 : vector<8x256xf32>, i32 -> vector<8x256xf32>
    %c8_103 = arith.constant 8 : index
    %c0_104 = arith.constant 0 : index
    %173 = vector.load %arg2[%c8_103, %c0_104] : memref<9x256xf32, #tpu.memory_space<vmem>>, vector<1x256xf32>
    %174 = vector.broadcast %173 : vector<1x256xf32> to vector<8x256xf32>
    %175 = arith.mulf %172, %174 : vector<8x256xf32>
    %c17 = arith.constant 17 : index
    %c0_105 = arith.constant 0 : index
    %c0_106 = arith.constant 0 : index
    %176 = vector.load %arg4[%c17, %c0_105, %c0_106] : memref<18x8x8xbf16, #tpu.memory_space<vmem>>, vector<1x8x8xbf16>
    %177 = vector.shape_cast %176 : vector<1x8x8xbf16> to vector<8x8xbf16>
    %178 = arith.truncf %175 : vector<8x256xf32> to vector<8x256xbf16>
    %cst_107 = arith.constant dense<0.000000e+00> : vector<8x256xf32>
    %179 = tpu.matmul %177, %178, %cst_107 {dimension_numbers = #tpu.dot_dimension_numbers<[1], [0], [0], [1], [0, 0, 1, 1], [], []>} : vector<8x8xbf16>, vector<8x256xbf16>, vector<8x256xf32> -> vector<8x256xf32>
    %180 = arith.addf %171, %179 : vector<8x256xf32>
    %c0_108 = arith.constant 0 : index
    %c5_109 = arith.constant 5 : index
    %181 = vector.load %arg3[%c0_108, %c5_109] : memref<8x6xf32, #tpu.memory_space<vmem>>, vector<8x1xf32>
    %182 = vector.broadcast %181 : vector<8x1xf32> to vector<8x256xf32>
    %183 = arith.addf %180, %182 : vector<8x256xf32>
    %184 = arith.addf %183, %1 : vector<8x256xf32>
    %c0_110 = arith.constant 0 : index
    %c0_111 = arith.constant 0 : index
    %c0_112 = arith.constant 0 : index
    %185 = vector.load %arg5[%c0_110, %c0_111, %c0_112] : memref<1x8x256xf32, #tpu.memory_space<vmem>>, vector<1x8x256xf32>
    %186 = vector.shape_cast %185 : vector<1x8x256xf32> to vector<8x256xf32>
    %187 = vector.shape_cast %184 : vector<8x256xf32> to vector<1x8x256xf32>
    tpu.vector_store %arg5[%c0_110, %c0_111, %c0_112], %187 {strides = array<i32>} : memref<1x8x256xf32, #tpu.memory_space<vmem>>, vector<1x8x256xf32>,
    return
  }
  func.func @transform_0(%arg0: i32) -> (i32, i32, i32) {
    %c0_i32 = arith.constant 0 : i32
    %c0_i32_0 = arith.constant 0 : i32
    %c0_i32_1 = arith.constant 0 : i32
    return %arg0, %c0_i32, %c0_i32_0 : i32, i32, i32
  }
  func.func @transform_1(%arg0: i32) -> (i32, i32) {
    %c0_i32 = arith.constant 0 : i32
    %c0_i32_0 = arith.constant 0 : i32
    %c0_i32_1 = arith.constant 0 : i32
    return %c0_i32, %c0_i32_0 : i32, i32
  }
  func.func @transform_2(%arg0: i32) -> (i32, i32) {
    %c0_i32 = arith.constant 0 : i32
    %c0_i32_0 = arith.constant 0 : i32
    %c0_i32_1 = arith.constant 0 : i32
    return %c0_i32, %c0_i32_0 : i32, i32
  }
  func.func @transform_3(%arg0: i32) -> (i32, i32, i32) {
    %c0_i32 = arith.constant 0 : i32
    %c0_i32_0 = arith.constant 0 : i32
    %c0_i32_1 = arith.constant 0 : i32
    %c0_i32_2 = arith.constant 0 : i32
    return %c0_i32, %c0_i32_0, %c0_i32_1 : i32, i32, i32
  }
  func.func @transform_4(%arg0: i32) -> (i32, i32, i32) {
    %c0_i32 = arith.constant 0 : i32
    %c0_i32_0 = arith.constant 0 : i32
    %c0_i32_1 = arith.constant 0 : i32
    return %arg0, %c0_i32, %c0_i32_0 : i32, i32, i32
  }
}

</mosaic_0001>

<bundles_post_ra>
// kernel: forward.1
= control target key start
LH: loop header
LB: loop body
LE: loop exit
PB: predicated region body
PF: predicated region fallthrough
CT: control target
= control target key end

     0   :  { %s1737_s15 = smov 0   ;;  %s2169_s0 = inlined_call_operand.vmem [shape: f32[2,8,256], index: 0, kind: input, shape index: {}]   ;;  %s2170_s1 = inlined_call_operand.vmem [shape: f32[9,256], index: 1, kind: input, shape index: {}]   ;;  %s2171_s2 = inlined_call_operand.vmem [shape: f32[8,6], index: 2, kind: input, shape index: {}]   ;;  %s2172_s3 = inlined_call_operand.vmem [shape: bf16[18,8,8], index: 3, kind: input, shape index: {}]   ;;  %s2173_s4 = inlined_call_operand.vmem [shape: f32[2,8,256], index: 4, kind: output, shape index: {}]  }
   0x1 LB: > { %s1568_s16 = sadd.s32 4294967295, %s1696_s15   ;;  %p1572_p0 = scmp.ge.s32.totalorder %s1696_s15, 1  ;;  %s1696_s15 = sphi %s1737_s15, %s14_s15  }
   0x2   : > { %p162_p1 = scmp.lt.s32.totalorder %s1696_s15, 3 }
   0x4   : > { %p163_p2 = pnand %p1572_p0, %p162_p1 }
   0x5   : > { %v1748_v0 = vld [vmem:[%s2171_s2] sm:$0xff] (!%p163_p2)  ;;  %v1698_v1 = vmov (!%p163_p2), 0   ;;  %v1699_v2 = vmov (!%p163_p2), 1   ;;  %p188_p3 = scmp.lt.s32.totalorder (!%p163_p2), %s1568_s16, 1  ;;  %s1700_s23 = smov (!%p163_p2), 16   ;;  %v1708_v21 = vmov (!%p163_p2), 2   ;;  %v233_v24 = vlaneseq (!%p163_p2) }
   0x6   : > { %166 = sbr.rel (%p163_p2) target bundleno = 955 (0x3bb), region = 36  ;;  %1667 = vset.pattern.permute.xlu0 (!%p163_p2), %v1698_v1  ;;  %324 = vmatprep.mubr.bf16.mxu0 (!%p163_p2), %v1698_v1  ;;  %s1701_s24 = smov (!%p163_p2), 17   ;;  %v1709_v22 = vmov (!%p163_p2), 3   ;;  %v1710_v23 = vmov (!%p163_p2), 4   ;;  %vm285_vm2 = vcmask (!%p163_p2), 1043456   ;;  %vm281_vm4 = vcmask (!%p163_p2), 64512  }
   0x7   : > { %204 = vperm.xlu0 (!%p163_p2), %1667, %v1748_v0   ;;  %374 = vmatprep.mubr.bf16.mxu1 (!%p163_p2), %v1698_v1  ;;  %s1702_s25 = smov (!%p163_p2), 15   ;;  %s1703_s26 = smov (!%p163_p2), 1   ;;  %v241_v25 = vshrl.u32 (!%p163_p2), %v233_v24, 7  ;;  %v1808_v26 = vand.u32 (!%p163_p2), 127, %v233_v24  ;;  %v1580_v56 = vld [vmem:[%s2172_s3 + $0x4] sm:$0xf] (!%p163_p2) }
   0x8   : > { %s1704_s27 = smov (!%p163_p2), 127   ;;  %s1705_s28 = smov (!%p163_p2), 113   ;;  %1669 = vset.pattern.permute.xlu1 (!%p163_p2), %v1708_v21  ;;  %v1579_v29 = vld [vmem:[%s2170_s1 + $0x1] ss:$8 sm:$0x3] (!%p163_p2) }
   0x9   : > { %s1706_s29 = smov (!%p163_p2), 112   ;;  %s1707_s30 = smov (!%p163_p2), 111   ;;  %v1810_v27 = vsub.s32 (!%p163_p2), 0, %v241_v25  ;;  %v1812_v28 = vsub.s32 (!%p163_p2), 1, %v241_v25  ;;  %vm259_vm0 = vcmp.lt.s32.totalorder (!%p163_p2), %v1808_v26, 16  ;;  %vm235_vm1 = vcmp.lt.s32.totalorder (!%p163_p2), %v1808_v26, 17 }
   0xa   : > { %v238_v34 = vld [vmem:[%s2170_s1] ss:$8 sm:$0x3] (!%p163_p2)  ;;  %v1585_v42 = vld [vmem:[%s2170_s1 + $0x2] ss:$8 sm:$0x3] (!%p163_p2) }
   0xb   : > { %1668 = vset.pattern.permute.xlu0 (!%p163_p2), %v1699_v2  ;;  %v1819_v32 = vrot.slane (!%p163_p2), %v1579_v29, %v1810_v27  ;;  %v1822_v33 = vrot.slane (!%p163_p2), %v1579_v29, %v1812_v28  ;;  %v1834_v40 = vrot.slane (!%p163_p2), %v238_v34, %v1810_v27  ;;  %v1841_v43 = vrot.slane (!%p163_p2), %v238_v34, %v1812_v28  ;;  %v1589_v55 = vld [vmem:[%s2170_s1 + $0x3] ss:$8 sm:$0x3] (!%p163_p2) }
   0xc   : > { %210 = vperm.xlu0 (!%p163_p2), %1668, %v1748_v0   ;;  %vm387_vm3 = vcmp.lt.s32.totalorder (!%p163_p2), %v1808_v26, 15  ;;  %v1849_v50 = vrot.slane (!%p163_p2), %v1585_v42, %v1810_v27  ;;  %v1855_v53 = vrot.slane (!%p163_p2), %v1585_v42, %v1812_v28  ;;  %vm465_vm5 = vcmp.lt.s32.totalorder (!%p163_p2), %v1808_v26, 1  ;;  %v1604_v42 = vld [vmem:[%s2170_s1 + $0x7] ss:$8 sm:$0x3] (!%p163_p2) }
   0xd   : > { %s2175_s16 = smov (!%p188_p3, %s1568_s16), 1  ;;  %v1870_v62 = vrot.slane %v1589_v55, %v1810_v27  ;;  %vm599_vm6 = vcmp.lt.s32.totalorder %v1808_v26, 127  ;;  %vm677_vm7 = vcmp.lt.s32.totalorder %v1808_v26, 113  ;;  %vm755_vm8 = vcmp.lt.s32.totalorder %v1808_v26, 112 }
   0xe   : > { %s1643_s19 = sshll.u32 %s2175_s16, 4  ;;  %vm833_vm9 = vcmp.lt.s32.totalorder %v1808_v26, 111 }
   0xf   : > { %s192_s22 = scalar_lea.vmem %s2169_s0, %s1643_s19  ;;  %s197_s6 = scalar_lea.vmem %s2173_s4, %s1643_s19 }
  0x10   : > { %v1763_v4 = vld [vmem:[%s192_s22] sm:$0xff]  ;;  %v1765_v5 = vld [vmem:[%s192_s22 + $0x8] sm:$0xff]  ;;  %1670 = vset.pattern.permute.xlu0 %v1709_v22 }
  0x11   : > { %v1600_v22 = vld [vmem:[%s2170_s1 + $0x6] ss:$8 sm:$0x3] }
  0x86   : > { %v205_v3 = vpop.permute.xlu0 %204 }
  0x87   : > { %v207_v6 = vmul.f32 %v205_v3, %v1763_v4  ;;  %v208_v7 = vmul.f32 %v205_v3, %v1765_v5 }
  0x8b   : > { %v211_v8 = vpop.permute.xlu0 %210 }
  0x8c   : > { %v213_v9 = vadd.f32 %v211_v8, %v207_v6  ;;  %v214_v10 = vadd.f32 %v211_v8, %v208_v7  ;;  %v1878_v7 = vrot.slane %v1589_v55, %v1812_v28  ;;  %v1596_v8 = vld [vmem:[%s2170_s1 + $0x5] ss:$8 sm:$0x3] }
  0x8e   : > { %v1577_v11 = vmul.f32 -1.442695, %v213_v9  ;;  %v1578_v12 = vmul.f32 -1.442695, %v214_v10 }
  0x90   : > { %1674 = vpow2.f32 %v1577_v11 }
  0x91   : > { %1676 = vpow2.f32 %v1578_v12 }
  0x9a   : > { %v1675_v13 = vpop.eup %1674 }
  0x9b   : > { %v1677_v14 = vpop.eup %1676  ;;  %v221_v15 = vadd.f32 1.0, %v1675_v13 }
  0x9c   : > { %v222_v16 = vadd.f32 1.0, %v1677_v14 }
  0x9d   : > { %1678 = vrcp.f32 %v221_v15 }
  0x9e   : > { %1680 = vrcp.f32 %v222_v16 }
  0xa7   : > { %v1679_v17 = vpop.eup %1678 }
  0xa8   : > { %v1681_v18 = vpop.eup %1680  ;;  %v1769_v19 = vmul.f32 %v1679_v17, %v213_v9  ;;  %v252_v9 = vld [vmem:[%s2172_s3] sm:$0xf]  ;;  %v1897_v17 = vrot.slane %v1596_v8, %v1810_v27 }
  0xa9   : > { %v1771_v20 = vmul.f32 %v1681_v18, %v214_v10 }
  0xaa   : > { %255 = vrot.lane.b32.xlu1 %v1769_v19, %s1700_s23  ;;  %v541_v14 = vpack.c.bf16 %v1769_v19, %v1769_v19 }
  0xab   : > { %231 = vrot.lane.b32.xlu0 %v1771_v20, %s1701_s24  ;;  %v542_v13 = vpack.c.bf16 %v1771_v20, %v1771_v20 }
  0xae   : > { %257 = vrot.lane.b32.xlu1 %v1771_v20, %s1700_s23 }
  0xaf   : > { %385 = vrot.lane.b32.xlu0 %v1771_v20, %s1702_s25 }
  0xb2   : > { %229 = vrot.lane.b32.xlu1 %v1769_v19, %s1701_s24 }
  0xb3   : > { %463 = vrot.lane.b32.xlu0 %v1771_v20, %s1703_s26 }
  0xb6   : > { %383 = vrot.lane.b32.xlu1 %v1769_v19, %s1702_s25 }
  0xb7   : > { %597 = vrot.lane.b32.xlu0 %v1771_v20, %s1704_s27 }
  0xba   : > { %461 = vrot.lane.b32.xlu1 %v1769_v19, %s1703_s26 }
  0xbb   : > { %675 = vrot.lane.b32.xlu0 %v1771_v20, %s1705_s28 }
  0xbe   : > { %595 = vrot.lane.b32.xlu1 %v1769_v19, %s1704_s27 }
  0xbf   : > { %753 = vrot.lane.b32.xlu0 %v1771_v20, %s1706_s29 }
  0xc2   : > { %673 = vrot.lane.b32.xlu1 %v1769_v19, %s1705_s28 }
  0xc3   : > { %831 = vrot.lane.b32.xlu0 %v1771_v20, %s1707_s30  ;;  %v1905_v20 = vrot.slane %v1596_v8, %v1812_v28 }
  0xc6   : > { %751 = vrot.lane.b32.xlu1 %v1769_v19, %s1706_s29 }
  0xc7   : > { %914 = vperm.xlu0 %1670, %v1748_v0  }
  0xca   : > { %829 = vrot.lane.b32.xlu1 %v1769_v19, %s1707_s30 }
  0xce   : > { %908 = vperm.xlu1 %1669, %v1748_v0  }
  0xd2   : > { %1671 = vset.pattern.permute.xlu1 %v1710_v23  ;;  %v1586_v23 = vld [vmem:[%s2172_s3 + $0x8] sm:$0xf] }
  0xd3   : > { %920 = vperm.xlu1 %1671, %v1748_v0  }
 0x11c   : > { %v256_v30 = vpop.permute.xlu1 %255 }
 0x11d   : > { %v232_v31 = vpop.permute.xlu0 %231 }
 0x120   : > { %v258_v35 = vpop.permute.xlu1 %257 }
 0x121   : > { %v386_v36 = vpop.permute.xlu0 %385  ;;  %v260_v37 = vsel %vm259_vm0, %v256_v30, %v258_v35  ;;  %v261_v38 = vsel %vm259_vm0, %v258_v35, %v256_v30 }
 0x122   : > { %v275_v39 = vmul.f32 %v1819_v32, %v261_v38  ;;  %v276_v41 = vmul.f32 %v1822_v33, %v260_v37 }
 0x124   : > { %v230_v44 = vpop.permute.xlu1 %229  ;;  %v280_v45 = vpack.c.bf16 %v276_v41, %v276_v41  ;;  %v279_v46 = vpack.c.bf16 %v275_v39, %v275_v39  ;;  %v1930_v41 = vrot.slane %v1600_v22, %v1812_v28 }
 0x125   : > { %v464_v47 = vpop.permute.xlu0 %463  ;;  %v236_v48 = vsel %vm235_vm1, %v230_v44, %v232_v31  ;;  %v237_v49 = vsel %vm235_vm1, %v232_v31, %v230_v44  ;;  %v547_v31 = vsel %vm285_vm2, %v541_v14, 0  ;;  %v1590_v44 = vld [vmem:[%s2172_s3 + $0xc] sm:$0xf] }
 0x126   : > { %v250_v51 = vmul.f32 %v1834_v40, %v237_v49  ;;  %1581 = vmatprep.subr.msk.bf16.mxu0 %vm285_vm2, %v280_v45  ;;  %v287_v52 = vsel %vm285_vm2, %v279_v46, 0  ;;  %v251_v54 = vmul.f32 %v1841_v43, %v236_v48 }
 0x127   : > { %293 = vmatpush1.bf16.msra.mxu0 %v287_v52 }
 0x128   : > { %v384_v57 = vpop.permute.xlu1 %383  ;;  %v254_v58 = vpack.c.bf16 %v251_v54, %v251_v54  ;;  %v253_v59 = vpack.c.bf16 %v250_v51, %v250_v51  ;;  %v1945_v51 = vrot.slane %v1604_v42, %v1810_v27 }
 0x129   : > { %v388_v60 = vsel %vm387_vm3, %v384_v57, %v386_v36  ;;  %v389_v61 = vsel %vm387_vm3, %v386_v36, %v384_v57  ;;  %v598_v63 = vpop.permute.xlu0 %597  ;;  %v1922_v36 = vrot.slane %v1600_v22, %v1810_v27  ;;  %v1953_v57 = vrot.slane %v1604_v42, %v1812_v28  ;;  %v1601_v22 = vld [vmem:[%s2172_s3 + $0x18] sm:$0xf] }
 0x12a   : > { %v403_v2 = vmul.f32 %v1849_v50, %v389_v61  ;;  %v404_v3 = vmul.f32 %v1855_v53, %v388_v60  ;;  %1582 = vmatmul.mubr.msk.bf16.vlgmr.msra.gmra.mrb[0].mxu0 %vm281_vm4, %v1580_v56  ;;  %1583 = vmatprep.subr.msk.bf16.mxu1 %vm285_vm2, %v254_v58  ;;  %v337_v6 = vsel %vm285_vm2, %v253_v59, 0  ;;  %v1608_v58 = vld [vmem:[%s2170_s1 + $0x10] ss:$8 sm:$0x3] }
 0x12b   : > { %343 = vmatpush1.bf16.msra.mxu1 %v337_v6  ;;  %450 = vmatprep.mubr.bf16.mxu0 %v1698_v1  ;;  %v1593_v59 = vld [vmem:[%s2172_s3 + $0x10] sm:$0xf]  ;;  %v1968_v6 = vrot.slane %v1608_v58, %v1810_v27 }
 0x12c   : > { %v407_v10 = vpack.c.bf16 %v403_v2, %v403_v2  ;;  %v408_v11 = vpack.c.bf16 %v404_v3, %v404_v3  ;;  %v462_v12 = vpop.permute.xlu1 %461 }
 0x12d   : > { %v466_v15 = vsel %vm465_vm5, %v462_v12, %v464_v47  ;;  %v467_v16 = vsel %vm465_vm5, %v464_v47, %v462_v12  ;;  %v676_v24 = vpop.permute.xlu0 %675  ;;  %v1597_v12 = vld [vmem:[%s2172_s3 + $0x14] sm:$0xf] }
 0x12e   : > { %v481_v18 = vmul.f32 %v1870_v62, %v467_v16  ;;  %v482_v21 = vmul.f32 %v1878_v7, %v466_v15  ;;  %1584 = vmatmul.mubr.msk.bf16.vlgmr.msra.gmra.mrb[0].mxu1 %vm281_vm4, %v252_v9  ;;  %1587 = vmatprep.subr.msk.bf16.mxu0 %vm285_vm2, %v408_v11  ;;  %v413_v19 = vsel %vm285_vm2, %v407_v10, 0  ;;  %v1976_v11 = vrot.slane %v1608_v58, %v1812_v28 }
 0x12f   : > { %419 = vmatpush1.bf16.msra.mxu0 %v413_v19  ;;  %528 = vmatprep.mubr.bf16.mxu1 %v1698_v1 }
 0x130   : > { %v485_v25 = vpack.c.bf16 %v481_v18, %v481_v18  ;;  %v486_v29 = vpack.c.bf16 %v482_v21, %v482_v21  ;;  %1594 = vmatprep.subr.msk.bf16.mxu0 %vm285_vm2, %v542_v13  ;;  %v596_v30 = vpop.permute.xlu1 %595 }
 0x131   : > { %v600_v34 = vsel %vm599_vm6, %v596_v30, %v598_v63  ;;  %v601_v35 = vsel %vm599_vm6, %v598_v63, %v596_v30  ;;  %v754_v52 = vpop.permute.xlu0 %753  ;;  %v1609_v30 = vld [vmem:[%s2172_s3 + $0x20] sm:$0xf] }
 0x132   : > { %v615_v37 = vmul.f32 %v1897_v17, %v600_v34  ;;  %v616_v38 = vmul.f32 %v1905_v20, %v601_v35  ;;  %1588 = vmatmul.mubr.msk.bf16.vlgmr.msra.gmra.mrb[4].mxu0 %vm281_vm4, %v1586_v23  ;;  %1591 = vmatprep.subr.msk.bf16.mxu1 %vm285_vm2, %v486_v29  ;;  %v491_v39 = vsel %vm285_vm2, %v485_v25, 0  ;;  %v1605_v29 = vld [vmem:[%s2172_s3 + $0x1c] sm:$0xf] }
 0x133   : > { %497 = vmatpush1.bf16.msra.mxu1 %v491_v39  ;;  %553 = vmatpush1.bf16.msra.mxu0 %v547_v31 }
 0x134   : > { %v619_v45 = vpack.c.bf16 %v615_v37, %v615_v37  ;;  %v620_v46 = vpack.c.bf16 %v616_v38, %v616_v38  ;;  %v674_v47 = vpop.permute.xlu1 %673  ;;  %584 = vmatprep.mubr.bf16.mxu0 %v1698_v1 }
 0x135   : > { %v678_v48 = vsel %vm677_vm7, %v674_v47, %v676_v24  ;;  %v679_v49 = vsel %vm677_vm7, %v676_v24, %v674_v47  ;;  %v832_v27 = vpop.permute.xlu0 %831 }
 0x136   : > { %v693_v54 = vmul.f32 %v1922_v36, %v678_v48  ;;  %v694_v55 = vmul.f32 %v1930_v41, %v679_v49  ;;  %1592 = vmatmul.mubr.msk.bf16.vlgmr.msra.gmra.mrb[4].mxu1 %vm281_vm4, %v1590_v44  ;;  %1598 = vmatprep.subr.msk.bf16.mxu1 %vm285_vm2, %v620_v46  ;;  %v625_v56 = vsel %vm285_vm2, %v619_v45, 0 }
 0x137   : > { %631 = vmatpush1.bf16.msra.mxu1 %v625_v56  ;;  %662 = vmatprep.mubr.bf16.mxu1 %v1698_v1 }
 0x138   : > { %v697_v60 = vpack.c.bf16 %v693_v54, %v693_v54  ;;  %v698_v61 = vpack.c.bf16 %v694_v55, %v694_v55  ;;  %v752_v63 = vpop.permute.xlu1 %751 }
 0x139   : > { %v756_v2 = vsel %vm755_vm8, %v752_v63, %v754_v52  ;;  %v757_v3 = vsel %vm755_vm8, %v754_v52, %v752_v63 }
 0x13a   : > { %v771_v8 = vmul.f32 %v1945_v51, %v756_v2  ;;  %v772_v9 = vmul.f32 %v1953_v57, %v757_v3  ;;  %1595 = vmatmul.mubr.msk.bf16.vlgmr.msra.gmra.mrb[8].mxu0 %vm281_vm4, %v1593_v59  ;;  %1602 = vmatprep.subr.msk.bf16.mxu0 %vm285_vm2, %v698_v61  ;;  %v703_v10 = vsel %vm285_vm2, %v697_v60, 0 }
 0x13b   : > { %709 = vmatpush1.bf16.msra.mxu0 %v703_v10  ;;  %740 = vmatprep.mubr.bf16.mxu0 %v1698_v1 }
 0x13c   : > { %v775_v13 = vpack.c.bf16 %v771_v8, %v771_v8  ;;  %v776_v14 = vpack.c.bf16 %v772_v9, %v772_v9  ;;  %v830_v15 = vpop.permute.xlu1 %829 }
 0x13d   : > { %v834_v16 = vsel %vm833_vm9, %v830_v15, %v832_v27  ;;  %v835_v18 = vsel %vm833_vm9, %v832_v27, %v830_v15 }
 0x13e   : > { %v849_v28 = vmul.f32 %v1968_v6, %v834_v16  ;;  %v850_v21 = vmul.f32 %v1976_v11, %v835_v18  ;;  %1599 = vmatmul.mubr.msk.bf16.vlgmr.msra.gmra.mrb[8].mxu1 %vm281_vm4, %v1597_v12  ;;  %1606 = vmatprep.subr.msk.bf16.mxu1 %vm285_vm2, %v776_v14  ;;  %v781_v19 = vsel %vm285_vm2, %v775_v13, 0 }
 0x13f   : > { %787 = vmatpush1.bf16.msra.mxu1 %v781_v19  ;;  %818 = vmatprep.mubr.bf16.mxu1 %v1698_v1 }
 0x140   : > { %v853_v23 = vpack.c.bf16 %v849_v28, %v849_v28  ;;  %v854_v24 = vpack.c.bf16 %v850_v21, %v850_v21 }
 0x142   : > { %1603 = vmatmul.mubr.msk.bf16.vlgmr.msra.gmra.mrb[12].mxu0 %vm281_vm4, %v1601_v22  ;;  %1610 = vmatprep.subr.msk.bf16.mxu0 %vm285_vm2, %v854_v24  ;;  %v859_v25 = vsel %vm285_vm2, %v853_v23, 0 }
 0x143   : > { %865 = vmatpush1.bf16.msra.mxu0 %v859_v25  ;;  %896 = vmatprep.mubr.bf16.mxu0 %v1698_v1 }
 0x146   : > { %1607 = vmatmul.mubr.msk.bf16.vlgmr.msra.gmra.mrb[12].mxu1 %vm281_vm4, %v1605_v29 }
 0x147   : > { %1004 = vmatprep.mubr.bf16.mxu1 %v1698_v1 }
 0x14a   : > { %1611 = vmatmul.mubr.msk.bf16.vlgmr.msra.gmra.mrb[16].mxu0 %vm281_vm4, %v1609_v30 }
 0x14b   : > { %1054 = vmatprep.mubr.bf16.mxu0 %v1698_v1 }
 0x1fd   : > { %v326_v31 = vpop.f32.mrb[0].mxu0 }
 0x1fe   : > { %v328_v34 = vpop.f32.mrb[1].mxu0 }
 0x1ff   : > { %v330_v35 = vpop.f32.mrb[2].mxu0 }
 0x200   : > { %v331_v37 = vpop.f32.mrb[3].mxu0  ;;  %v909_v35 = vpop.permute.xlu1 %908 }
 0x201   : > { %v376_v38 = vpop.f32.mrb[0].mxu1 }
 0x202   : > { %v377_v39 = vadd.f32 %v376_v38, %v326_v31  ;;  %v378_v42 = vpop.f32.mrb[1].mxu1 }
 0x203   : > { %v379_v44 = vadd.f32 %v378_v42, %v328_v34  ;;  %v380_v45 = vpop.f32.mrb[2].mxu1 }
 0x204   : > { %v381_v46 = vpop.f32.mrb[3].mxu1 }
 0x205   : > { %v452_v47 = vpop.f32.mrb[4].mxu0  ;;  %v915_v46 = vpop.permute.xlu0 %914 }
 0x206   : > { %v459_v48 = vadd.f32 %v452_v47, %v377_v39  ;;  %v454_v49 = vpop.f32.mrb[5].mxu0 }
 0x207   : > { %v460_v52 = vadd.f32 %v454_v49, %v379_v44  ;;  %v456_v54 = vpop.f32.mrb[6].mxu0 }
 0x208   : > { %v457_v55 = vpop.f32.mrb[7].mxu0 }
 0x209   : > { %v530_v56 = vpop.f32.mrb[4].mxu1 }
 0x20a   : > { %v537_v58 = vadd.f32 %v530_v56, %v459_v48  ;;  %v532_v59 = vpop.f32.mrb[5].mxu1 }
 0x20b   : > { %v538_v60 = vadd.f32 %v532_v59, %v460_v52  ;;  %v534_v61 = vpop.f32.mrb[6].mxu1  ;;  %v921_v52 = vpop.permute.xlu1 %920 }
 0x20c   : > { %v535_v63 = vpop.f32.mrb[7].mxu1 }
 0x20d   : > { %v586_v2 = vpop.f32.mrb[8].mxu0 }
 0x20e   : > { %v593_v3 = vadd.f32 %v586_v2, %v537_v58  ;;  %v588_v8 = vpop.f32.mrb[9].mxu0 }
 0x20f   : > { %v594_v9 = vadd.f32 %v588_v8, %v538_v60  ;;  %v590_v10 = vpop.f32.mrb[10].mxu0 }
 0x210   : > { %v591_v12 = vpop.f32.mrb[11].mxu0 }
 0x211   : > { %v664_v27 = vpop.f32.mrb[8].mxu1 }
 0x212   : > { %v671_v13 = vadd.f32 %v664_v27, %v593_v3  ;;  %v666_v14 = vpop.f32.mrb[9].mxu1  ;;  %v1711_v27 = vmov 5  }
 0x213   : > { %v672_v15 = vadd.f32 %v666_v14, %v594_v9  ;;  %v668_v16 = vpop.f32.mrb[10].mxu1  ;;  %1672 = vset.pattern.permute.xlu1 %v1711_v27  ;;  %1673 = vset.pattern.permute.xlu0 %v1711_v27 }
 0x214   : > { %v669_v18 = vpop.f32.mrb[11].mxu1 }
 0x215   : > { %v742_v28 = vpop.f32.mrb[12].mxu0 }
 0x216   : > { %v749_v21 = vadd.f32 %v742_v28, %v671_v13  ;;  %v744_v19 = vpop.f32.mrb[13].mxu0 }
 0x217   : > { %v750_v22 = vadd.f32 %v744_v19, %v672_v15  ;;  %v746_v23 = vpop.f32.mrb[14].mxu0 }
 0x218   : > { %v747_v24 = vpop.f32.mrb[15].mxu0 }
 0x219   : > { %v820_v25 = vpop.f32.mrb[12].mxu1 }
 0x21a   : > { %v827_v29 = vadd.f32 %v820_v25, %v749_v21  ;;  %v822_v30 = vpop.f32.mrb[13].mxu1 }
 0x21b   : > { %v828_v31 = vadd.f32 %v822_v30, %v750_v22  ;;  %v824_v34 = vpop.f32.mrb[14].mxu1 }
 0x21c   : > { %v825_v37 = vpop.f32.mrb[15].mxu1 }
 0x21d   : > { %v898_v38 = vpop.f32.mrb[16].mxu0 }
 0x21e   : > { %v905_v39 = vadd.f32 %v898_v38, %v827_v29  ;;  %v900_v42 = vpop.f32.mrb[17].mxu0 }
 0x21f   : > { %v906_v44 = vadd.f32 %v900_v42, %v828_v31  ;;  %v902_v45 = vpop.f32.mrb[18].mxu0 }
 0x220   : > { %v911_v47 = vadd.f32 %v909_v35, %v905_v39  ;;  %v903_v48 = vpop.f32.mrb[19].mxu0 }
 0x221   : > { %v912_v49 = vadd.f32 %v909_v35, %v906_v44  ;;  %v1614_v44 = vld [vmem:[%s2172_s3 + $0x24] sm:$0xf] }
 0x222   : > { %v917_v54 = vmul.f32 %v915_v46, %v911_v47 }
 0x223   : > { %v918_v55 = vmul.f32 %v915_v46, %v912_v49 }
 0x224   : > { %v923_v56 = vadd.f32 %v921_v52, %v917_v54 }
 0x225   : > { %v924_v58 = vadd.f32 %v921_v52, %v918_v55 }
 0x226   : > { %v1612_v59 = vmul.f32 -1.442695, %v923_v56 }
 0x227   : > { %v1613_v60 = vmul.f32 -1.442695, %v924_v58 }
 0x228   : > { %1682 = vpow2.f32 %v1612_v59 }
 0x229   : > { %1684 = vpow2.f32 %v1613_v60 }
 0x232   : > { %v1683_v61 = vpop.eup %1682 }
 0x233   : > { %v1685_v63 = vpop.eup %1684  ;;  %v931_v2 = vadd.f32 1.0, %v1683_v61 }
 0x234   : > { %v932_v3 = vadd.f32 1.0, %v1685_v63 }
 0x235   : > { %1686 = vrcp.f32 %v931_v2 }
 0x236   : > { %1688 = vrcp.f32 %v932_v3 }
 0x23f   : > { %v1687_v8 = vpop.eup %1686 }
 0x240   : > { %v1689_v9 = vpop.eup %1688  ;;  %v2009_v10 = vmul.f32 %v1687_v8, %v923_v56 }
 0x241   : > { %v2011_v12 = vmul.f32 %v1689_v9, %v924_v58  ;;  %v1620_v58 = vld [vmem:[%s2172_s3 + $0x2c] sm:$0xf] }
 0x242   : > { %951 = vrot.lane.b32.xlu1 %v2009_v10, %s1700_s23  ;;  %v1193_v48 = vpack.c.bf16 %v2009_v10, %v2009_v10 }
 0x243   : > { %953 = vrot.lane.b32.xlu0 %v2011_v12, %s1700_s23  ;;  %v1194_v55 = vpack.c.bf16 %v2011_v12, %v2011_v12 }
 0x244   : > { %v1199_v8 = vsel %vm285_vm2, %v1193_v48, 0 }
 0x246   : > { %939 = vrot.lane.b32.xlu1 %v2009_v10, %s1701_s24 }
 0x247   : > { %941 = vrot.lane.b32.xlu0 %v2011_v12, %s1701_s24 }
 0x24a   : > { %1063 = vrot.lane.b32.xlu1 %v2009_v10, %s1702_s25 }
 0x24b   : > { %1065 = vrot.lane.b32.xlu0 %v2011_v12, %s1702_s25 }
 0x24e   : > { %1127 = vrot.lane.b32.xlu1 %v2009_v10, %s1703_s26 }
 0x24f   : > { %1129 = vrot.lane.b32.xlu0 %v2011_v12, %s1703_s26 }
 0x252   : > { %1247 = vrot.lane.b32.xlu1 %v2009_v10, %s1704_s27 }
 0x253   : > { %1249 = vrot.lane.b32.xlu0 %v2011_v12, %s1704_s27 }
 0x256   : > { %1311 = vrot.lane.b32.xlu1 %v2009_v10, %s1705_s28 }
 0x257   : > { %1313 = vrot.lane.b32.xlu0 %v2011_v12, %s1705_s28 }
 0x25a   : > { %1375 = vrot.lane.b32.xlu1 %v2009_v10, %s1706_s29 }
 0x25b   : > { %1377 = vrot.lane.b32.xlu0 %v2011_v12, %s1706_s29 }
 0x25e   : > { %1439 = vrot.lane.b32.xlu1 %v2009_v10, %s1707_s30  ;;  %v1623_v10 = vld [vmem:[%s2172_s3 + $0x30] sm:$0xf] }
 0x25f   : > { %1441 = vrot.lane.b32.xlu0 %v2011_v12, %s1707_s30 }
 0x262   : > { %1504 = vperm.xlu1 %1672, %v1748_v0  }
 0x2b4   : > { %v952_v13 = vpop.permute.xlu1 %951 }
 0x2b5   : > { %v954_v14 = vpop.permute.xlu0 %953 }
 0x2b6   : > { %v955_v15 = vsel %vm259_vm0, %v952_v13, %v954_v14  ;;  %v956_v16 = vsel %vm259_vm0, %v954_v14, %v952_v13 }
 0x2b7   : > { %v957_v18 = vmul.f32 %v956_v16, %v1819_v32  ;;  %v958_v28 = vmul.f32 %v955_v15, %v1822_v33  ;;  %v1615_v33 = vld [vmem:[%s2172_s3 + $0x28] sm:$0xf] }
 0x2b8   : > { %v940_v21 = vpop.permute.xlu1 %939 }
 0x2b9   : > { %v961_v19 = vpack.c.bf16 %v957_v18, %v957_v18  ;;  %v962_v22 = vpack.c.bf16 %v958_v28, %v958_v28  ;;  %v942_v23 = vpop.permute.xlu0 %941  ;;  %v1626_v28 = vld [vmem:[%s2172_s3 + $0x34] sm:$0xf] }
 0x2ba   : > { %v943_v24 = vsel %vm235_vm1, %v940_v21, %v942_v23  ;;  %v944_v0 = vsel %vm235_vm1, %v942_v23, %v940_v21 }
 0x2bb   : > { %v945_v25 = vmul.f32 %v944_v0, %v1834_v40  ;;  %v946_v29 = vmul.f32 %v943_v24, %v1841_v43  ;;  %1616 = vmatprep.subr.msk.bf16.mxu1 %vm285_vm2, %v962_v22  ;;  %v967_v32 = vsel %vm285_vm2, %v961_v19, 0 }
 0x2bc   : > { %v1064_v30 = vpop.permute.xlu1 %1063  ;;  %973 = vmatpush1.bf16.msra.mxu1 %v967_v32 }
 0x2bd   : > { %v949_v31 = vpack.c.bf16 %v945_v25, %v945_v25  ;;  %v950_v34 = vpack.c.bf16 %v946_v29, %v946_v29  ;;  %v1066_v35 = vpop.permute.xlu0 %1065  ;;  %v1629_v29 = vld [vmem:[%s2172_s3 + $0x38] sm:$0xf] }
 0x2be   : > { %v1067_v37 = vsel %vm387_vm3, %v1064_v30, %v1066_v35  ;;  %v1068_v40 = vsel %vm387_vm3, %v1066_v35, %v1064_v30 }
 0x2bf   : > { %v1069_v43 = vmul.f32 %v1068_v40, %v1849_v50  ;;  %v1070_v38 = vmul.f32 %v1067_v37, %v1855_v53  ;;  %1617 = vmatmul.mubr.msk.bf16.vlgmr.msra.gmra.mrb[16].mxu1 %vm281_vm4, %v1615_v33  ;;  %1618 = vmatprep.subr.msk.bf16.mxu0 %vm285_vm2, %v950_v34  ;;  %v1017_v39 = vsel %vm285_vm2, %v949_v31, 0  ;;  %v1632_v37 = vld [vmem:[%s2172_s3 + $0x3c] sm:$0xf] }
 0x2c0   : > { %v1128_v42 = vpop.permute.xlu1 %1127  ;;  %1023 = vmatpush1.bf16.msra.mxu0 %v1017_v39  ;;  %1116 = vmatprep.mubr.bf16.mxu1 %v1698_v1 }
 0x2c1   : > { %v1073_v45 = vpack.c.bf16 %v1069_v43, %v1069_v43  ;;  %v1074_v46 = vpack.c.bf16 %v1070_v38, %v1070_v38  ;;  %v1130_v47 = vpop.permute.xlu0 %1129  ;;  %v1638_v43 = vld [vmem:[%s2172_s3 + $0x44] sm:$0xf] }
 0x2c2   : > { %v1131_v50 = vsel %vm465_vm5, %v1128_v42, %v1130_v47  ;;  %v1132_v53 = vsel %vm465_vm5, %v1130_v47, %v1128_v42 }
 0x2c3   : > { %v1133_v49 = vmul.f32 %v1132_v53, %v1870_v62  ;;  %v1134_v52 = vmul.f32 %v1131_v50, %v1878_v7  ;;  %1619 = vmatmul.mubr.msk.bf16.vlgmr.msra.gmra.mrb[20].mxu0 %vm281_vm4, %v1614_v44  ;;  %1621 = vmatprep.subr.msk.bf16.mxu1 %vm285_vm2, %v1074_v46  ;;  %v1079_v54 = vsel %vm285_vm2, %v1073_v45, 0 }
 0x2c4   : > { %v1248_v56 = vpop.permute.xlu1 %1247  ;;  %1085 = vmatpush1.bf16.msra.mxu1 %v1079_v54  ;;  %1180 = vmatprep.mubr.bf16.mxu0 %v1698_v1 }
 0x2c5   : > { %v1137_v62 = vpack.c.bf16 %v1133_v49, %v1133_v49  ;;  %v1138_v59 = vpack.c.bf16 %v1134_v52, %v1134_v52  ;;  %v1250_v7 = vpop.permute.xlu0 %1249  ;;  %1627 = vmatprep.subr.msk.bf16.mxu1 %vm285_vm2, %v1194_v55 }
 0x2c6   : > { %v1251_v60 = vsel %vm599_vm6, %v1248_v56, %v1250_v7  ;;  %v1252_v61 = vsel %vm599_vm6, %v1250_v7, %v1248_v56 }
 0x2c7   : > { %v1253_v63 = vmul.f32 %v1251_v60, %v1897_v17  ;;  %v1254_v2 = vmul.f32 %v1252_v61, %v1905_v20  ;;  %1622 = vmatmul.mubr.msk.bf16.vlgmr.msra.gmra.mrb[20].mxu1 %vm281_vm4, %v1620_v58  ;;  %1624 = vmatprep.subr.msk.bf16.mxu0 %vm285_vm2, %v1138_v59  ;;  %v1143_v3 = vsel %vm285_vm2, %v1137_v62, 0 }
 0x2c8   : > { %v1312_v9 = vpop.permute.xlu1 %1311  ;;  %1149 = vmatpush1.bf16.msra.mxu0 %v1143_v3  ;;  %1205 = vmatpush1.bf16.msra.mxu1 %v1199_v8 }
 0x2c9   : > { %v1257_v12 = vpack.c.bf16 %v1253_v63, %v1253_v63  ;;  %v1258_v27 = vpack.c.bf16 %v1254_v2, %v1254_v2  ;;  %v1314_v17 = vpop.permute.xlu0 %1313  ;;  %1236 = vmatprep.mubr.bf16.mxu1 %v1698_v1 }
 0x2ca   : > { %v1315_v20 = vsel %vm677_vm7, %v1312_v9, %v1314_v17  ;;  %v1316_v13 = vsel %vm677_vm7, %v1314_v17, %v1312_v9 }
 0x2cb   : > { %v1317_v14 = vmul.f32 %v1315_v20, %v1922_v36  ;;  %v1318_v15 = vmul.f32 %v1316_v13, %v1930_v41  ;;  %1625 = vmatmul.mubr.msk.bf16.vlgmr.msra.gmra.mrb[24].mxu0 %vm281_vm4, %v1623_v10  ;;  %1630 = vmatprep.subr.msk.bf16.mxu0 %vm285_vm2, %v1258_v27  ;;  %v1263_v16 = vsel %vm285_vm2, %v1257_v12, 0 }
 0x2cc   : > { %v1376_v18 = vpop.permute.xlu1 %1375  ;;  %1269 = vmatpush1.bf16.msra.mxu0 %v1263_v16  ;;  %1300 = vmatprep.mubr.bf16.mxu0 %v1698_v1 }
 0x2cd   : > { %v1321_v21 = vpack.c.bf16 %v1317_v14, %v1317_v14  ;;  %v1322_v19 = vpack.c.bf16 %v1318_v15, %v1318_v15  ;;  %v1378_v22 = vpop.permute.xlu0 %1377 }
 0x2ce   : > { %v1379_v36 = vsel %vm755_vm8, %v1376_v18, %v1378_v22  ;;  %v1380_v41 = vsel %vm755_vm8, %v1378_v22, %v1376_v18 }
 0x2cf   : > { %v1381_v23 = vmul.f32 %v1379_v36, %v1945_v51  ;;  %v1382_v24 = vmul.f32 %v1380_v41, %v1953_v57  ;;  %1628 = vmatmul.mubr.msk.bf16.vlgmr.msra.gmra.mrb[24].mxu1 %vm281_vm4, %v1626_v28  ;;  %1633 = vmatprep.subr.msk.bf16.mxu1 %vm285_vm2, %v1322_v19  ;;  %v1327_v0 = vsel %vm285_vm2, %v1321_v21, 0 }
 0x2d0   : > { %v1440_v25 = vpop.permute.xlu1 %1439  ;;  %1333 = vmatpush1.bf16.msra.mxu1 %v1327_v0  ;;  %1364 = vmatprep.mubr.bf16.mxu1 %v1698_v1 }
 0x2d1   : > { %v1385_v32 = vpack.c.bf16 %v1381_v23, %v1381_v23  ;;  %v1386_v30 = vpack.c.bf16 %v1382_v24, %v1382_v24  ;;  %v1442_v33 = vpop.permute.xlu0 %1441 }
 0x2d2   : > { %v1443_v51 = vsel %vm833_vm9, %v1440_v25, %v1442_v33  ;;  %v1444_v57 = vsel %vm833_vm9, %v1442_v33, %v1440_v25 }
 0x2d3   : > { %v1445_v31 = vmul.f32 %v1443_v51, %v1968_v6  ;;  %v1446_v34 = vmul.f32 %v1444_v57, %v1976_v11  ;;  %1631 = vmatmul.mubr.msk.bf16.vlgmr.msra.gmra.mrb[28].mxu0 %vm281_vm4, %v1629_v29  ;;  %1636 = vmatprep.subr.msk.bf16.mxu0 %vm285_vm2, %v1386_v30  ;;  %v1391_v35 = vsel %vm285_vm2, %v1385_v32, 0  ;;  %v1635_v11 = vld [vmem:[%s2172_s3 + $0x40] sm:$0xf] }
 0x2d4   : > { %1397 = vmatpush1.bf16.msra.mxu0 %v1391_v35  ;;  %1428 = vmatprep.mubr.bf16.mxu0 %v1698_v1 }
 0x2d5   : > { %v1449_v40 = vpack.c.bf16 %v1445_v31, %v1445_v31  ;;  %v1450_v26 = vpack.c.bf16 %v1446_v34, %v1446_v34 }
 0x2d7   : > { %1634 = vmatmul.mubr.msk.bf16.vlgmr.msra.gmra.mrb[28].mxu1 %vm281_vm4, %v1632_v37  ;;  %1639 = vmatprep.subr.msk.bf16.mxu1 %vm285_vm2, %v1450_v26  ;;  %v1455_v6 = vsel %vm285_vm2, %v1449_v40, 0 }
 0x2d8   : > { %1461 = vmatpush1.bf16.msra.mxu1 %v1455_v6  ;;  %1492 = vmatprep.mubr.bf16.mxu1 %v1698_v1 }
 0x2db   : > { %1637 = vmatmul.mubr.msk.bf16.vlgmr.msra.gmra.mrb[32].mxu0 %vm281_vm4, %v1635_v11 }
 0x2df   : > { %1640 = vmatmul.mubr.msk.bf16.vlgmr.msra.gmra.mrb[32].mxu1 %vm281_vm4, %v1638_v43 }
 0x2e1   : > { %v1505_v29 = vpop.permute.xlu1 %1504 }
 0x392   : > { %v1006_v38 = vpop.f32.mrb[16].mxu1 }
 0x393   : > { %v1008_v39 = vpop.f32.mrb[17].mxu1 }
 0x394   : > { %v1010_v42 = vpop.f32.mrb[18].mxu1 }
 0x395   : > { %v1011_v44 = vpop.f32.mrb[19].mxu1 }
 0x396   : > { %v1056_v45 = vpop.f32.mrb[20].mxu0 }
 0x397   : > { %v1057_v46 = vadd.f32 %v1056_v45, %v1006_v38  ;;  %v1058_v47 = vpop.f32.mrb[21].mxu0 }
 0x398   : > { %v1059_v50 = vadd.f32 %v1058_v47, %v1008_v39  ;;  %v1060_v53 = vpop.f32.mrb[22].mxu0 }
 0x399   : > { %v1061_v48 = vpop.f32.mrb[23].mxu0 }
 0x39a   : > { %v1118_v49 = vpop.f32.mrb[20].mxu1 }
 0x39b   : > { %v1125_v1 = vadd.f32 %v1118_v49, %v1057_v46  ;;  %v1120_v52 = vpop.f32.mrb[21].mxu1 }
 0x39c   : > { %v1126_v54 = vadd.f32 %v1120_v52, %v1059_v50  ;;  %v1122_v55 = vpop.f32.mrb[22].mxu1 }
 0x39d   : > { %v1123_v56 = vpop.f32.mrb[23].mxu1 }
 0x39e   : > { %v1182_v58 = vpop.f32.mrb[24].mxu0 }
 0x39f   : > { %v1189_v62 = vadd.f32 %v1182_v58, %v1125_v1  ;;  %v1184_v59 = vpop.f32.mrb[25].mxu0 }
 0x3a0   : > { %v1190_v7 = vadd.f32 %v1184_v59, %v1126_v54  ;;  %v1186_v60 = vpop.f32.mrb[26].mxu0 }
 0x3a1   : > { %v1187_v61 = vpop.f32.mrb[27].mxu0 }
 0x3a2   : > { %v1238_v63 = vpop.f32.mrb[24].mxu1 }
 0x3a3   : > { %v1245_v2 = vadd.f32 %v1238_v63, %v1189_v62  ;;  %v1240_v3 = vpop.f32.mrb[25].mxu1 }
 0x3a4   : > { %v1246_v8 = vadd.f32 %v1240_v3, %v1190_v7  ;;  %v1242_v9 = vpop.f32.mrb[26].mxu1 }
 0x3a5   : > { %v1243_v10 = vpop.f32.mrb[27].mxu1 }
 0x3a6   : > { %v1302_v12 = vpop.f32.mrb[28].mxu0 }
 0x3a7   : > { %v1309_v27 = vadd.f32 %v1302_v12, %v1245_v2  ;;  %v1304_v17 = vpop.f32.mrb[29].mxu0 }
 0x3a8   : > { %v1310_v20 = vadd.f32 %v1304_v17, %v1246_v8  ;;  %v1306_v13 = vpop.f32.mrb[30].mxu0 }
 0x3a9   : > { %v1307_v14 = vpop.f32.mrb[31].mxu0 }
 0x3aa   : > { %v1366_v15 = vpop.f32.mrb[28].mxu1 }
 0x3ab   : > { %v1373_v16 = vadd.f32 %v1366_v15, %v1309_v27  ;;  %v1368_v18 = vpop.f32.mrb[29].mxu1 }
 0x3ac   : > { %v1374_v28 = vadd.f32 %v1368_v18, %v1310_v20  ;;  %v1370_v21 = vpop.f32.mrb[30].mxu1 }
 0x3ad   : > { %v1371_v19 = vpop.f32.mrb[31].mxu1 }
 0x3ae   : > { %v1430_v22 = vpop.f32.mrb[32].mxu0 }
 0x3af   : > { %v1437_v36 = vadd.f32 %v1430_v22, %v1373_v16  ;;  %v1432_v41 = vpop.f32.mrb[33].mxu0 }
 0x3b0   : > { %v1438_v23 = vadd.f32 %v1432_v41, %v1374_v28  ;;  %v1434_v24 = vpop.f32.mrb[34].mxu0 }
 0x3b1   : > { %v1435_v0 = vpop.f32.mrb[35].mxu0 }
 0x3b2   : > { %v1494_v25 = vpop.f32.mrb[32].mxu1 }
 0x3b3   : > { %v1501_v32 = vadd.f32 %v1494_v25, %v1437_v36  ;;  %v1496_v30 = vpop.f32.mrb[33].mxu1 }
 0x3b4   : > { %v1502_v33 = vadd.f32 %v1496_v30, %v1438_v23  ;;  %v1498_v51 = vpop.f32.mrb[34].mxu1 }
 0x3b5   : > { %v1507_v57 = vadd.f32 %v1505_v29, %v1501_v32  ;;  %v1499_v31 = vpop.f32.mrb[35].mxu1 }
 0x3b6   : > { %v1508_v34 = vadd.f32 %v1505_v29, %v1502_v33 }
 0x3b7   : > { %v1509_v35 = vadd.f32 %v1507_v57, %v1763_v4 }
 0x3b8   : > { %v1510_v37 = vadd.f32 %v1508_v34, %v1765_v5 }
 0x3b9   : > { %1511 = vst [vmem:[%s197_s6] sm:$0xff] %v1509_v35 }
 0x3ba   : > { %1512 = vst [vmem:[%s197_s6 + $0x8] sm:$0xff] %v1510_v37 }
 0x3bb PF: > { %s14_s15 = sadd.s32 1, %s1696_s15  }
 0x3bc   : > { %p11_p4 = scmp.ge.s32.totalorder %s14_s15, 4  }
 0x3be   :  { %13 = sbr.rel (!%p11_p4) target bundleno = 1 (0x1), region = 90 }

</bundles_post_ra>
